<compile_context>
chip_gen: v7x
topology: tpu7x:2x2x1
jax: 0.10.0
libtpu: 0.0.40
codegen_flags: <defaults>
</compile_context>

<pallas_src>
import functools

import jax
import jax.numpy as jnp
from jax.experimental import pallas as pl
from jax.experimental.pallas import tpu as pltpu


def _round_up(x, m):
    return ((x + m - 1) // m) * m


# Conservative vs. the 16-32 MiB scoped-VMEM defaults (and v7x's 64 MiB part).
_VMEM_BUDGET = 24 * 1024 * 1024


# ---------------------------------------------------------------------------
# Kernels
# ---------------------------------------------------------------------------
def _linear_resident_kernel(x_ref, w_ref, b_ref, o_ref):
    """Single-shot linear: whole K reduction, whole (padded) N, W resident.

    x_ref: (tm, Dp)   flattened-input tile
    w_ref: (Dp, Np)   full weight, constant index map (fetched once)
    b_ref: (1,  Np)   full bias
    o_ref: (tm, Np)   output tile
    No scratch, no reduction grid axis, no pl.when phases.
    """
    o_ref[...] = (
        jnp.dot(x_ref[...], w_ref[...], preferred_element_type=jnp.float32)
        + b_ref[...]
    ).astype(o_ref.dtype)


def _linear_tiled_kernel(x_ref, w_ref, b_ref, o_ref, acc_ref):
    """Fallback for weights too large to keep resident: 3-D tiled matmul.

    Bias is folded into the k == 0 accumulator init (no epilogue add pass).
    """
    k = pl.program_id(2)

    @pl.when(k == 0)
    def _():
        acc_ref[...] = jnp.broadcast_to(
            b_ref[...].astype(jnp.float32), acc_ref.shape
        )

    acc_ref[...] += jnp.dot(
        x_ref[...], w_ref[...], preferred_element_type=jnp.float32
    )

    @pl.when(k == pl.num_programs(2) - 1)
    def _():
        o_ref[...] = acc_ref[...].astype(o_ref.dtype)


# ---------------------------------------------------------------------------
# One-time parameter prep (outside the hot path)
# ---------------------------------------------------------------------------
def prepare_params(weight, bias, *, lane=128):
    """Transpose torch-style weight (N, D) -> (Dp, Np), zero-padded to 128.

    D is only padded when it is not already 128-aligned, so no zero rows are
    MAC'd for the common aligned case; x never needs a K-pad then either.
    """
    N, D = weight.shape
    Dp = _round_up(D, lane)
    Np = _round_up(N, lane)
    w_dn = jnp.zeros((Dp, Np), weight.dtype).at[:D, :N].set(weight.T)
    b_p = jnp.zeros((1, Np), bias.dtype).at[0, :N].set(bias)
    return w_dn, b_p


# ---------------------------------------------------------------------------
# Tiling heuristics
# ---------------------------------------------------------------------------
def _choose_batch_tile(B):
    """Returns (Bp, tm).  Prefer >=2 M blocks once B is large (v7x 2 TCs),
    never pad small/medium batches (block dim == full array dim is legal)."""
    if B <= 128:
        return B, B
    for tm in (512, 256, 128):
        if B % tm == 0 and B // tm >= 2:
            return B, tm
    if B <= 512:
        return B, B
    return _round_up(B, 256), 256          # large ragged batch: pad rows once


def _divisor_candidates(n, candidates):
    return [c for c in candidates if n % c == 0]


# ---------------------------------------------------------------------------
# Forward
# ---------------------------------------------------------------------------
@functools.partial(jax.jit, static_argnames=("nlabels",))
def regression_forward(x, w_dn, b_p, *, nlabels):
    """x: (B, C, H, W); w_dn: (Dp, Np) pre-transposed/padded; b_p: (1, Np)."""
    B = x.shape[0]
    Dp, Np = w_dn.shape
    D = x.size // B                        # C*H*W, row-major == torch .view
    if D > Dp:
        raise ValueError(
            f"input has D={D} features but prepare_params produced Dp={Dp}; "
            "parameters must be prepared for this input size."
        )
    itemsize = jnp.dtype(x.dtype).itemsize

    x_flat = x.reshape(B, D)
    if D < Dp:
        # Only when D is not 128-aligned (rare): one K-pad of x.
        x_flat = jnp.pad(x_flat, ((0, 0), (0, Dp - D)))

    Bp, tm = _choose_batch_tile(B)
    if Bp != B:
        # Only for very large *and* ragged batches.
        x_flat = jnp.pad(x_flat, ((0, Bp - B), (0, 0)))

    # ---------------- Path A: weight resident, K grid collapsed -------------
    resident_bytes = (
        2 * tm * Dp + 2 * Dp * Np + 2 * tm * Np + 2 * Np
    ) * itemsize

    if resident_bytes <= _VMEM_BUDGET:
        vmem_limit = int(min(max(resident_bytes + (2 << 20), 16 << 20), 48 << 20))
        out = pl.pallas_call(
            _linear_resident_kernel,
            out_shape=jax.ShapeDtypeStruct((Bp, Np), x.dtype),
            grid_spec=pltpu.PrefetchScalarGridSpec(
                num_scalar_prefetch=0,
                grid=(Bp // tm,),
                in_specs=[
                    pl.BlockSpec((tm, Dp), lambda i: (i, 0)),   # x tile
                    pl.BlockSpec((Dp, Np), lambda i: (0, 0)),   # W resident
                    pl.BlockSpec((1, Np), lambda i: (0, 0)),    # bias resident
                ],
                out_specs=pl.BlockSpec((tm, Np), lambda i: (i, 0)),
            ),
            compiler_params=pltpu.CompilerParams(
                dimension_semantics=("parallel",),
                vmem_limit_bytes=vmem_limit,
            ),
        )(x_flat, w_dn, b_p)
        return out[:B, :nlabels]

    # ---------------- Path B: tiled matmul (huge weight) --------------------
    tk_cands = _divisor_candidates(Dp, (2048, 1024, 768, 512, 384, 256, 128))
    tn_cands = _divisor_candidates(Np, (512, 384, 256, 128))
    tk, tn = tk_cands[0], tn_cands[0]

    def tiled_bytes(tm_, tk_, tn_):
        return (2 * (tm_ * tk_ + tk_ * tn_ + tm_ * tn_ + tn_)) * itemsize + \
               4 * tm_ * tn_                                   # f32 accumulator

    i_k = i_n = 0
    while tiled_bytes(tm, tk, tn) > _VMEM_BUDGET:
        if i_k + 1 < len(tk_cands):
            i_k += 1
            tk = tk_cands[i_k]
        elif i_n + 1 < len(tn_cands):
            i_n += 1
            tn = tn_cands[i_n]
        else:
            break

    vmem_limit = int(
        min(max(tiled_bytes(tm, tk, tn) + (2 << 20), 16 << 20), 48 << 20)
    )
    out = pl.pallas_call(
        _linear_tiled_kernel,
        out_shape=jax.ShapeDtypeStruct((Bp, Np), x.dtype),
        grid_spec=pltpu.PrefetchScalarGridSpec(
            num_scalar_prefetch=0,
            grid=(Bp // tm, Np // tn, Dp // tk),
            in_specs=[
                pl.BlockSpec((tm, tk), lambda i, j, k: (i, k)),   # x
                pl.BlockSpec((tk, tn), lambda i, j, k: (k, j)),   # W (D, N)
                pl.BlockSpec((1, tn), lambda i, j, k: (0, j)),    # bias
            ],
            out_specs=pl.BlockSpec((tm, tn), lambda i, j, k: (i, j)),
            scratch_shapes=[pltpu.VMEM((tm, tn), jnp.float32)],
        ),
        compiler_params=pltpu.CompilerParams(
            dimension_semantics=("parallel", "parallel", "arbitrary"),
            vmem_limit_bytes=vmem_limit,
        ),
    )(x_flat, w_dn, b_p)
    return out[:B, :nlabels]


def init_params(key, c_in, input_size, nlabels, dtype=jnp.float32):
    """Deterministic init matching nn.Linear shapes (uniform +/- 1/sqrt(D))."""
    D = c_in * input_size * input_size
    kw, kb = jax.random.split(key)
    bound = 1.0 / jnp.sqrt(jnp.asarray(D, dtype))
    weight = jax.random.uniform(kw, (nlabels, D), dtype, -bound, bound)
    bias = jax.random.uniform(kb, (nlabels,), dtype, -bound, bound)
    return weight, bias


if __name__ == "__main__":
    # Small shapes consistent with the module: batch=2, c_in=3, spatial=16,
    # nlabels=10 -> features D = 3*16*16 = 768 (128-aligned, so no x padding).
    B, C, S, NLABELS = 2, 3, 16, 10

    key = jax.random.PRNGKey(0)
    kx, kp = jax.random.split(key)
    x = jax.random.normal(kx, (B, C, S, S), jnp.float32)
    weight, bias = init_params(kp, C, S, NLABELS)

    # One-time parameter prep (transpose + pad) outside the hot path.
    w_dn, b_p = prepare_params(weight, bias)

    out = regression_forward(x, w_dn, b_p, nlabels=NLABELS)
    out = jax.block_until_ready(out)

    # Reference check against plain JAX (torch semantics: x.view(B,-1) @ W^T + b).
    ref = x.reshape(B, -1) @ weight.T + bias
    assert out.shape == (B, NLABELS)
    assert jnp.allclose(out, ref, atol=1e-4, rtol=1e-4)

    print("KERNEL_OK")
</pallas_src>

<mosaic_0001>
module attributes {stable_mosaic.version = 11 : i64} {
  func.func @_linear_resident_kernel(%arg0: i32, %arg1: memref<2x768xf32, #tpu.memory_space<vmem>>, %arg2: memref<768x128xf32, #tpu.memory_space<vmem>>, %arg3: memref<1x128xf32, #tpu.memory_space<vmem>>, %arg4: memref<2x128xf32, #tpu.memory_space<vmem>>) attributes {dimension_semantics = [#tpu.dimension_semantics<parallel>], iteration_bounds = array<i64: 1>, scalar_prefetch = 0 : i64, scratch_operands = 0 : i64, tpu.core_type = #tpu.core_type<tc>, window_params = [{transform_indices = @transform_0, window_bounds = array<i64: 2, 768>}, {pipeline_mode = #tpu.pipeline_mode<synchronous>, transform_indices = @transform_1, window_bounds = array<i64: 768, 128>}, {pipeline_mode = #tpu.pipeline_mode<synchronous>, transform_indices = @transform_2, window_bounds = array<i64: 1, 128>}, {transform_indices = @transform_3, window_bounds = array<i64: 2, 128>}]} {
    %c0 = arith.constant 0 : index
    %c0_0 = arith.constant 0 : index
    %0 = vector.load %arg1[%c0, %c0_0] : memref<2x768xf32, #tpu.memory_space<vmem>>, vector<2x768xf32>
    %c0_1 = arith.constant 0 : index
    %c0_2 = arith.constant 0 : index
    %1 = vector.load %arg2[%c0_1, %c0_2] : memref<768x128xf32, #tpu.memory_space<vmem>>, vector<768x128xf32>
    %cst = arith.constant dense<0.000000e+00> : vector<2x128xf32>
    %2 = tpu.matmul %0, %1, %cst {dimension_numbers = #tpu.dot_dimension_numbers<[1], [0], [0], [1], [0, 0, 1, 1], [], []>} : vector<2x768xf32>, vector<768x128xf32>, vector<2x128xf32> -> vector<2x128xf32>
    %c0_3 = arith.constant 0 : index
    %c0_4 = arith.constant 0 : index
    %3 = vector.load %arg3[%c0_3, %c0_4] : memref<1x128xf32, #tpu.memory_space<vmem>>, vector<1x128xf32>
    %4 = vector.broadcast %3 : vector<1x128xf32> to vector<2x128xf32>
    %5 = arith.addf %2, %4 : vector<2x128xf32>
    %c0_5 = arith.constant 0 : index
    %c0_6 = arith.constant 0 : index
    %6 = vector.load %arg4[%c0_5, %c0_6] : memref<2x128xf32, #tpu.memory_space<vmem>>, vector<2x128xf32>
    tpu.vector_store %arg4[%c0_5, %c0_6], %5 {strides = array<i32>} : memref<2x128xf32, #tpu.memory_space<vmem>>, vector<2x128xf32>,
    return
  }
  func.func @transform_0(%arg0: i32) -> (i32, i32) {
    %c0_i32 = arith.constant 0 : i32
    %c0_i32_0 = arith.constant 0 : i32
    return %arg0, %c0_i32 : i32, i32
  }
  func.func @transform_1(%arg0: i32) -> (i32, i32) {
    %c0_i32 = arith.constant 0 : i32
    %c0_i32_0 = arith.constant 0 : i32
    %c0_i32_1 = arith.constant 0 : i32
    return %c0_i32, %c0_i32_0 : i32, i32
  }
  func.func @transform_2(%arg0: i32) -> (i32, i32) {
    %c0_i32 = arith.constant 0 : i32
    %c0_i32_0 = arith.constant 0 : i32
    %c0_i32_1 = arith.constant 0 : i32
    return %c0_i32, %c0_i32_0 : i32, i32
  }
  func.func @transform_3(%arg0: i32) -> (i32, i32) {
    %c0_i32 = arith.constant 0 : i32
    %c0_i32_0 = arith.constant 0 : i32
    return %arg0, %c0_i32 : i32, i32
  }
}

</mosaic_0001>

<bundles_post_ra>
// kernel: regression_forward.1
= control target key start
LH: loop header
LB: loop body
LE: loop exit
PB: predicated region body
PF: predicated region fallthrough
CT: control target
= control target key end

     0   :  { %8 = vsyncpa [#allocation3], 0  ;;  %s708_s0 = inlined_call_operand.vmem [shape: f32[2,768], index: 0, kind: input, shape index: {}]   ;;  %s709_s1 = inlined_call_operand.hbm [shape: f32[768,128], index: 1, kind: input, shape index: {}]   ;;  %s710_s2 = inlined_call_operand.vmem [shape: f32[1,128], index: 2, kind: input, shape index: {}]   ;;  %s711_s3 = inlined_call_operand.hbm [shape: f32[2,128], index: 3, kind: output, shape index: {}]  }
   0x1   :  { %9 = vsyncpa [#allocation4], 0  ;;  %s650_s12 = smov [#allocation2]   ;;  %s602_s16 = scalar_lea.hbm %s709_s1, 12288 }
   0x2   :  { %s17_s13 = sshll.u32 %s650_s12, 4  ;;  %p603_p0 = scmp.ne.s32.totalorder %s709_s1, %s602_s16  ;;  %s18_s13 = int_to_ptr.vmem [resolvable:$true] %s17_s13 }
   0x3   :  { %p606_p1 = scmp.lt.u32.totalorder %s602_s16, %s709_s1 }
   0x5   :  { %p608_p2 = pnand %p606_p1, %p603_p0 }
   0x7   :  { %611 = shalt.err (!%p608_p2)
}
   0x8   :  { %s612_s21 = scalar_lea.vmem %s18_s13, 12288  ;;  %p617_p4 = scmp.lt.s32.totalorder %s18_s13, %s18_s13 }
   0x9   :  { %p613_p3 = scmp.ne.s32.totalorder %s18_s13, %s612_s21  ;;  %p618_p5 = scmp.lt.s32.totalorder %s612_s21, %s612_s21 }
   0xb   :  { %p619_p6 = por %p618_p5, %p617_p4 }
   0xd   :  { %p620_p7 = pnand %p619_p6, %p613_p3 }
   0xf   :  { %623 = shalt.err (!%p620_p7)
}
  0x10   :  { %s651_s22 = smov 128   ;;  %s652_s23 = smov 8  }
  0x11   :  { %23 = dma.hbm_to_vmem [thread:$0]  %s709_s1, 12288, %s18_s13, [#allocation3], %s651_s22, %s651_s22, %s652_s23  }
  0x12   :  { %646 = dma.done.wait [#allocation3], 12288  }
  0x13   :  { %647 = vsyncadd [#allocation3], 4294955008  ;;  %v47_v0 = vld [vmem:[#allocation2 + $0x80] sm:$0xff]  ;;  %v48_v1 = vld [vmem:[#allocation2 + $0x88] sm:$0xff]  ;;  %v653_v43 = vmov 1983009808   ;;  %v140_v45 = vlaneseq }
  0x14   :  { %v31_v2 = vld [vmem:[#allocation2] sm:$0xff]  ;;  %v500_v3 = vpack.c.bf16 %v48_v1, %v47_v0  ;;  %v32_v4 = vld [vmem:[#allocation2 + $0x8] sm:$0xff]  ;;  %v49_v11 = vld [vmem:[#allocation2 + $0x90] sm:$0xff]  ;;  %v138_v44 = vunpack.c.l.s4 %v653_v43  ;;  %s654_s30 = smov [#allocation5]  }
  0x15   :  { %v79_v5 = vld [vmem:[#allocation2 + $0x180] sm:$0xff]  ;;  %v80_v6 = vld [vmem:[#allocation2 + $0x188] sm:$0xff]  ;;  %v502_v7 = vpack.c.bf16 %v32_v4, %v31_v2  ;;  %v50_v13 = vld [vmem:[#allocation2 + $0x98] sm:$0xff]  ;;  %v141_v60 = vshrl.u32 %v140_v45, 7  ;;  %s384_s4 = sshll.u32 %s654_s30, 4  ;;  %s385_s4 = int_to_ptr.vmem [resolvable:$true] %s384_s4 }
  0x16   :  { %v532_v8 = vpack.c.bf16 %v80_v6, %v79_v5  ;;  %v63_v9 = vld [vmem:[#allocation2 + $0x100] sm:$0xff]  ;;  %v64_v10 = vld [vmem:[#allocation2 + $0x108] sm:$0xff]  ;;  %501 = vmatprep.subr.bf16.mxu0 %v500_v3  ;;  %v33_v14 = vld [vmem:[#allocation2 + $0x10] sm:$0xff]  ;;  %v504_v16 = vpack.c.bf16 %v50_v13, %v49_v11  ;;  %v139_v59 = vunpack.c.0.s8 %v138_v44  ;;  %s624_s5 = scalar_lea.vmem %s385_s4, 32  ;;  %p629_p9 = scmp.lt.s32.totalorder %s385_s4, %s385_s4 }
  0x17   :  { %v534_v12 = vpack.c.bf16 %v64_v10, %v63_v9  ;;  %v34_v15 = vld [vmem:[#allocation2 + $0x18] sm:$0xff]  ;;  %503 = vmatpush3.bf16.msra.mxu0 %v502_v7  ;;  %v81_v18 = vld [vmem:[#allocation2 + $0x190] sm:$0xff]  ;;  %v51_v23 = vld [vmem:[#allocation2 + $0xa0] sm:$0xff]  ;;  %p625_p8 = scmp.ne.s32.totalorder %s385_s4, %s624_s5  ;;  %p630_p10 = scmp.lt.s32.totalorder %s624_s5, %s624_s5 }
  0x18   :  { %533 = vmatprep.subr.bf16.mxu1 %v532_v8  ;;  %v506_v17 = vpack.c.bf16 %v34_v15, %v33_v14  ;;  %v82_v19 = vld [vmem:[#allocation2 + $0x198] sm:$0xff]  ;;  %v65_v20 = vld [vmem:[#allocation2 + $0x110] sm:$0xff]  ;;  %v52_v24 = vld [vmem:[#allocation2 + $0xa8] sm:$0xff]  ;;  %505 = vmatprep.subr.bf16.mxu0 %v504_v16  ;;  %v142_v10 = vsub.s32 %v139_v59, %v141_v60 }
  0x19   :  { %535 = vmatpush3.bf16.msra.mxu1 %v534_v12  ;;  %v536_v21 = vpack.c.bf16 %v82_v19, %v81_v18  ;;  %v66_v22 = vld [vmem:[#allocation2 + $0x118] sm:$0xff]  ;;  %v508_v26 = vpack.c.bf16 %v52_v24, %v51_v23  ;;  %v35_v27 = vld [vmem:[#allocation2 + $0x20] sm:$0xff]  ;;  %v36_v28 = vld [vmem:[#allocation2 + $0x28] sm:$0xff]  ;;  %p631_p11 = por %p630_p10, %p629_p9 }
  0x1a   :  { %v538_v25 = vpack.c.bf16 %v66_v22, %v65_v20  ;;  %v83_v29 = vld [vmem:[#allocation2 + $0x1a0] sm:$0xff]  ;;  %v84_v30 = vld [vmem:[#allocation2 + $0x1a8] sm:$0xff]  ;;  %v510_v33 = vpack.c.bf16 %v36_v28, %v35_v27  ;;  %v53_v35 = vld [vmem:[#allocation2 + $0xb0] sm:$0xff] }
  0x1b   :  { %537 = vmatprep.subr.bf16.mxu1 %v536_v21  ;;  %v67_v31 = vld [vmem:[#allocation2 + $0x120] sm:$0xff]  ;;  %v68_v32 = vld [vmem:[#allocation2 + $0x128] sm:$0xff]  ;;  %507 = vmatpush3.bf16.msra.mxu0 %v506_v17  ;;  %v540_v34 = vpack.c.bf16 %v84_v30, %v83_v29  ;;  %v54_v36 = vld [vmem:[#allocation2 + $0xb8] sm:$0xff]  ;;  %p632_p12 = pnand %p631_p11, %p625_p8 }
  0x1c   :  { %v37_v37 = vld [vmem:[#allocation2 + $0x30] sm:$0xff]  ;;  %509 = vmatprep.subr.bf16.mxu0 %v508_v26  ;;  %v542_v38 = vpack.c.bf16 %v68_v32, %v67_v31  ;;  %v512_v39 = vpack.c.bf16 %v54_v36, %v53_v35  ;;  %v38_v40 = vld [vmem:[#allocation2 + $0x38] sm:$0xff]  ;;  %v55_v49 = vld [vmem:[#allocation2 + $0xc0] sm:$0xff] }
  0x1d   :  { %539 = vmatpush3.bf16.msra.mxu1 %v538_v25  ;;  %v85_v41 = vld [vmem:[#allocation2 + $0x1b0] sm:$0xff]  ;;  %v86_v42 = vld [vmem:[#allocation2 + $0x1b8] sm:$0xff]  ;;  %v56_v50 = vld [vmem:[#allocation2 + $0xc8] sm:$0xff]  ;;  %v514_v51 = vpack.c.bf16 %v38_v40, %v37_v37 }
  0x1e   :  { %541 = vmatprep.subr.bf16.mxu1 %v540_v34  ;;  %v544_v46 = vpack.c.bf16 %v86_v42, %v85_v41  ;;  %v69_v47 = vld [vmem:[#allocation2 + $0x130] sm:$0xff]  ;;  %v70_v48 = vld [vmem:[#allocation2 + $0x138] sm:$0xff]  ;;  %v87_v52 = vld [vmem:[#allocation2 + $0x1c0] sm:$0xff]  ;;  %v516_v55 = vpack.c.bf16 %v56_v50, %v55_v49 }
  0x1f   :  { %511 = vmatpush3.bf16.msra.mxu0 %v510_v33  ;;  %v88_v53 = vld [vmem:[#allocation2 + $0x1c8] sm:$0xff]  ;;  %v546_v54 = vpack.c.bf16 %v70_v48, %v69_v47  ;;  %v39_v56 = vld [vmem:[#allocation2 + $0x40] sm:$0xff]  ;;  %v57_v63 = vld [vmem:[#allocation2 + $0xd0] sm:$0xff] }
  0x20   :  { %513 = vmatprep.subr.bf16.mxu0 %v512_v39  ;;  %v40_v57 = vld [vmem:[#allocation2 + $0x48] sm:$0xff]  ;;  %v71_v58 = vld [vmem:[#allocation2 + $0x140] sm:$0xff]  ;;  %v548_v61 = vpack.c.bf16 %v88_v53, %v87_v52  ;;  %v58_v0 = vld [vmem:[#allocation2 + $0xd8] sm:$0xff] }
  0x21   :  { %543 = vmatpush3.bf16.msra.mxu1 %v542_v38  ;;  %v72_v62 = vld [vmem:[#allocation2 + $0x148] sm:$0xff]  ;;  %v89_v1 = vld [vmem:[#allocation2 + $0x1d0] sm:$0xff]  ;;  %v90_v2 = vld [vmem:[#allocation2 + $0x1d8] sm:$0xff]  ;;  %v518_v3 = vpack.c.bf16 %v40_v57, %v39_v56  ;;  %v520_v6 = vpack.c.bf16 %v58_v0, %v57_v63 }
  0x22   :  { %545 = vmatprep.subr.bf16.mxu1 %v544_v46  ;;  %v41_v4 = vld [vmem:[#allocation2 + $0x50] sm:$0xff]  ;;  %v550_v5 = vpack.c.bf16 %v72_v62, %v71_v58  ;;  %v42_v7 = vld [vmem:[#allocation2 + $0x58] sm:$0xff]  ;;  %v552_v11 = vpack.c.bf16 %v90_v2, %v89_v1  ;;  %v59_v12 = vld [vmem:[#allocation2 + $0xe0] sm:$0xff] }
  0x23   :  { %515 = vmatpush3.bf16.msra.mxu0 %v514_v51  ;;  %v73_v8 = vld [vmem:[#allocation2 + $0x150] sm:$0xff]  ;;  %v74_v9 = vld [vmem:[#allocation2 + $0x158] sm:$0xff]  ;;  %v60_v13 = vld [vmem:[#allocation2 + $0xe8] sm:$0xff]  ;;  %v522_v16 = vpack.c.bf16 %v42_v7, %v41_v4 }
  0x24   :  { %517 = vmatprep.subr.bf16.mxu0 %v516_v55  ;;  %v91_v14 = vld [vmem:[#allocation2 + $0x1e0] sm:$0xff]  ;;  %v92_v15 = vld [vmem:[#allocation2 + $0x1e8] sm:$0xff]  ;;  %v554_v17 = vpack.c.bf16 %v74_v9, %v73_v8  ;;  %v524_v19 = vpack.c.bf16 %v60_v13, %v59_v12  ;;  %v61_v27 = vld [vmem:[#allocation2 + $0xf0] sm:$0xff] }
  0x25   :  { %547 = vmatpush3.bf16.msra.mxu1 %v546_v54  ;;  %v29_v18 = vld [vmem:[%s708_s0] sm:$0xff]  ;;  %v44_v21 = vld [vmem:[#allocation2 + $0x68] sm:$0xff]  ;;  %v556_v25 = vpack.c.bf16 %v92_v15, %v91_v14  ;;  %v62_v28 = vld [vmem:[#allocation2 + $0xf8] sm:$0xff] }
  0x26   :  { %549 = vmatprep.subr.bf16.mxu1 %v548_v61  ;;  %v43_v20 = vld [vmem:[#allocation2 + $0x60] sm:$0xff]  ;;  %v143_v23 = vrot.slane %v29_v18, %v142_v10  ;;  %v136_v24 = vcombine.high %v29_v18, %v29_v18  ;;  %v76_v26 = vld [vmem:[#allocation2 + $0x168] sm:$0xff]  ;;  %v93_v29 = vld [vmem:[#allocation2 + $0x1f0] sm:$0xff]  ;;  %v528_v35 = vpack.c.bf16 %v62_v28, %v61_v27 }
  0x27   :  { %519 = vmatpush3.bf16.msra.mxu0 %v518_v3  ;;  %v75_v22 = vld [vmem:[#allocation2 + $0x160] sm:$0xff]  ;;  %v94_v30 = vld [vmem:[#allocation2 + $0x1f8] sm:$0xff]  ;;  %v526_v33 = vpack.c.bf16 %v44_v21, %v43_v20  ;;  %v45_v36 = vld [vmem:[#allocation2 + $0x70] sm:$0xff] }
  0x28   :  { %521 = vmatprep.subr.bf16.mxu0 %v520_v6  ;;  %v151_v31 = vcombine.high %v143_v23, %v143_v23  ;;  %v150_v32 = vrot.slane %v136_v24, %v142_v10  ;;  %v558_v34 = vpack.c.bf16 %v76_v26, %v75_v22  ;;  %v46_v37 = vld [vmem:[#allocation2 + $0x78] sm:$0xff]  ;;  %v77_v38 = vld [vmem:[#allocation2 + $0x170] sm:$0xff]  ;;  %v560_v40 = vpack.c.bf16 %v94_v30, %v93_v29  ;;  %v111_v42 = vld [vmem:[#allocation2 + $0x280] sm:$0xff] }
  0x29   :  { %551 = vmatpush3.bf16.msra.mxu1 %v550_v5  ;;  %v78_v41 = vld [vmem:[#allocation2 + $0x178] sm:$0xff]  ;;  %v112_v43 = vld [vmem:[#allocation2 + $0x288] sm:$0xff]  ;;  %v530_v44 = vpack.c.bf16 %v46_v37, %v45_v36  ;;  %v95_v47 = vld [vmem:[#allocation2 + $0x200] sm:$0xff] }
  0x2a   :  { %553 = vmatprep.subr.bf16.mxu1 %v552_v11  ;;  %v152_v39 = vcombine.high %v150_v32, %v150_v32  ;;  %231 = vmatprep.mubr.f32.mxu0 %v151_v31  ;;  %v562_v45 = vpack.c.bf16 %v78_v41, %v77_v38  ;;  %v564_v46 = vpack.c.bf16 %v112_v43, %v111_v42  ;;  %v96_v48 = vld [vmem:[#allocation2 + $0x208] sm:$0xff]  ;;  %v113_v49 = vld [vmem:[#allocation2 + $0x290] sm:$0xff]  ;;  %v114_v50 = vld [vmem:[#allocation2 + $0x298] sm:$0xff] }
  0x2b   :  { %523 = vmatpush3.bf16.msra.mxu0 %v522_v16  ;;  %v566_v51 = vpack.c.bf16 %v96_v48, %v95_v47  ;;  %v394_v52 = vld.sshfl [vmem:[%s708_s0 + $0x8] sm:$0x33 pattern:$0x76325410]  ;;  %v568_v53 = vpack.c.bf16 %v114_v50, %v113_v49  ;;  %v97_v54 = vld [vmem:[#allocation2 + $0x210] sm:$0xff]  ;;  %v98_v55 = vld [vmem:[#allocation2 + $0x218] sm:$0xff] }
  0x2c   :  { %525 = vmatprep.subr.bf16.mxu0 %v524_v19  ;;  %301 = vmatprep.mubr.f32.mxu1 %v152_v39  ;;  %v160_v56 = vcombine.high %v394_v52, %v394_v52  ;;  %v115_v57 = vld [vmem:[#allocation2 + $0x2a0] sm:$0xff]  ;;  %v116_v58 = vld [vmem:[#allocation2 + $0x2a8] sm:$0xff]  ;;  %v570_v59 = vpack.c.bf16 %v98_v55, %v97_v54  ;;  %v117_v63 = vld [vmem:[#allocation2 + $0x2b0] sm:$0xff] }
  0x2d   :  { %555 = vmatpush3.bf16.msra.mxu1 %v554_v17  ;;  %v572_v60 = vpack.c.bf16 %v116_v58, %v115_v57  ;;  %v99_v61 = vld [vmem:[#allocation2 + $0x220] sm:$0xff]  ;;  %v100_v62 = vld [vmem:[#allocation2 + $0x228] sm:$0xff]  ;;  %v118_v0 = vld [vmem:[#allocation2 + $0x2b8] sm:$0xff] }
  0x2e   :  { %557 = vmatprep.subr.bf16.mxu1 %v556_v25  ;;  %v574_v1 = vpack.c.bf16 %v100_v62, %v99_v61  ;;  %v576_v2 = vpack.c.bf16 %v118_v0, %v117_v63  ;;  %v101_v3 = vld [vmem:[#allocation2 + $0x230] sm:$0xff]  ;;  %v102_v4 = vld [vmem:[#allocation2 + $0x238] sm:$0xff]  ;;  %v119_v5 = vld [vmem:[#allocation2 + $0x2c0] sm:$0xff] }
  0x2f   :  { %527 = vmatpush3.bf16.msra.mxu0 %v526_v33  ;;  %v120_v6 = vld [vmem:[#allocation2 + $0x2c8] sm:$0xff]  ;;  %v578_v7 = vpack.c.bf16 %v102_v4, %v101_v3  ;;  %v103_v9 = vld [vmem:[#allocation2 + $0x240] sm:$0xff]  ;;  %v121_v11 = vld [vmem:[#allocation2 + $0x2d0] sm:$0xff] }
  0x30   :  { %529 = vmatprep.subr.bf16.mxu0 %v528_v35  ;;  %v580_v8 = vpack.c.bf16 %v120_v6, %v119_v5  ;;  %v104_v10 = vld [vmem:[#allocation2 + $0x248] sm:$0xff]  ;;  %v122_v12 = vld [vmem:[#allocation2 + $0x2d8] sm:$0xff]  ;;  %v105_v15 = vld [vmem:[#allocation2 + $0x250] sm:$0xff] }
  0x31   :  { %559 = vmatpush3.bf16.msra.mxu1 %v558_v34  ;;  %v582_v13 = vpack.c.bf16 %v104_v10, %v103_v9  ;;  %v584_v14 = vpack.c.bf16 %v122_v12, %v121_v11  ;;  %v106_v16 = vld [vmem:[#allocation2 + $0x258] sm:$0xff]  ;;  %v123_v17 = vld [vmem:[#allocation2 + $0x2e0] sm:$0xff]  ;;  %v124_v18 = vld [vmem:[#allocation2 + $0x2e8] sm:$0xff] }
  0x32   :  { %561 = vmatprep.subr.bf16.mxu1 %v560_v40  ;;  %v586_v19 = vpack.c.bf16 %v106_v16, %v105_v15  ;;  %v588_v20 = vpack.c.bf16 %v124_v18, %v123_v17  ;;  %v107_v21 = vld [vmem:[#allocation2 + $0x260] sm:$0xff]  ;;  %v108_v22 = vld [vmem:[#allocation2 + $0x268] sm:$0xff]  ;;  %v126_v24 = vld [vmem:[#allocation2 + $0x2f8] sm:$0xff] }
  0x33   :  { %531 = vmatpush3.bf16.msra.mxu0 %v530_v44  ;;  %v590_v25 = vpack.c.bf16 %v108_v22, %v107_v21  ;;  %v109_v27 = vld [vmem:[#allocation2 + $0x270] sm:$0xff]  ;;  %v110_v28 = vld [vmem:[#allocation2 + $0x278] sm:$0xff]  ;;  %v393_v31 = vld [vmem:[%s710_s2] ss:$0 sm:$0xff] }
  0x34   :  { %565 = vmatprep.subr.bf16.mxu0 %v564_v46  ;;  %v594_v29 = vpack.c.bf16 %v110_v28, %v109_v27 }
  0x35   :  { %563 = vmatpush3.bf16.msra.mxu1 %v562_v45 }
  0x36   :  { %232 = vmatmul.mubr.f32.vlgmr.msra.gmra.mrb[0].mxu0 %v143_v23  ;;  %v125_v23 = vld [vmem:[#allocation2 + $0x2f0] sm:$0xff] }
  0x37   :  { %567 = vmatpush3.bf16.msra.mxu0 %v566_v51  ;;  %371 = vmatprep.mubr.f32.mxu0 %v160_v56  ;;  %v592_v26 = vpack.c.bf16 %v126_v24, %v125_v23 }
  0x38   :  { %302 = vmatmul.mubr.f32.vlgmr.msra.gmra.mrb[0].mxu1 %v150_v32  ;;  %569 = vmatprep.subr.bf16.mxu0 %v568_v53 }
  0x3b   :  { %571 = vmatpush3.bf16.msra.mxu0 %v570_v59 }
  0x3c   :  { %573 = vmatprep.subr.bf16.mxu0 %v572_v60 }
  0x3f   :  { %575 = vmatpush3.bf16.msra.mxu0 %v574_v1 }
  0x40   :  { %577 = vmatprep.subr.bf16.mxu0 %v576_v2 }
  0x43   :  { %579 = vmatpush3.bf16.msra.mxu0 %v578_v7 }
  0x44   :  { %581 = vmatprep.subr.bf16.mxu0 %v580_v8 }
  0x47   :  { %583 = vmatpush3.bf16.msra.mxu0 %v582_v13 }
  0x48   :  { %585 = vmatprep.subr.bf16.mxu0 %v584_v14 }
  0x4b   :  { %587 = vmatpush3.bf16.msra.mxu0 %v586_v19 }
  0x4c   :  { %589 = vmatprep.subr.bf16.mxu0 %v588_v20 }
  0x4f   :  { %591 = vmatpush3.bf16.msra.mxu0 %v590_v25 }
  0x50   :  { %593 = vmatprep.subr.bf16.mxu0 %v592_v26 }
  0x53   :  { %595 = vmatpush3.bf16.msra.mxu0 %v594_v29 }
  0x56   :  { %372 = vmatmul.mubr.f32.vlgmr.msra.gmra.mrb[2].mxu0 %v394_v52 }
 0x109   :  { %v427_v30 = vpop.f32.mrb[0].mxu0 }
 0x10a   :  { %v428_v32 = vpop.f32.mrb[1].mxu0 }
 0x10b   :  { %v462_v33 = vpop.f32.mrb[0].mxu1  ;;  %v429_v34 = vadd.f32 %v428_v32, %v427_v30 }
 0x10c   :  { %v463_v35 = vpop.f32.mrb[1].mxu1 }
 0x10d   :  { %v464_v36 = vadd.f32 %v463_v35, %v462_v33  ;;  %v234_v37 = vadd.f32 %v429_v34, %v393_v31 }
 0x10f   :  { %v304_v38 = vadd.f32 %v464_v36, %v234_v37 }
 0x129   :  { %v497_v39 = vpop.f32.mrb[2].mxu0 }
 0x12a   :  { %v498_v40 = vpop.f32.mrb[3].mxu0 }
 0x12b   :  { %v499_v41 = vadd.f32 %v498_v40, %v497_v39 }
 0x12d   :  { %v374_v42 = vadd.f32 %v499_v41, %v304_v38 }
 0x12f   :  { %377 = vst [vmem:[#allocation5] sm:$0x3] %v374_v42 }
 0x130   :  { %635 = shalt.err (!%p632_p12)
}
 0x131   :  { %s636_s7 = scalar_lea.hbm %s711_s3, 32 }
 0x132   :  { %p637_p13 = scmp.ne.s32.totalorder %s711_s3, %s636_s7  ;;  %p640_p0 = scmp.lt.u32.totalorder %s636_s7, %s711_s3 }
 0x134   :  { %p642_p1 = pnand %p640_p0, %p637_p13 }
 0x136   :  { %645 = shalt.err (!%p642_p1)
}
 0x137   :  { %387 = dma.vmem_to_hbm [thread:$0]  %s385_s4, 32, %s711_s3, [#allocation4]  }
 0x138   :  { %648 = dma.done.wait [#allocation4], 32  }
 0x139   :  { %649 = vsyncadd [#allocation4], 4294967264 }
 0x13a   :  { %391 = vsyncpa [#allocation3], 1 }
 0x13b   :  { %392 = vsyncpa [#allocation4], 1 }

</bundles_post_ra>
